<compile_context>
chip_gen: v7x
topology: tpu7x:2x2x1
jax: 0.10.0
libtpu: 0.0.40
codegen_flags: <defaults>
</compile_context>

<pallas_src>
import functools

import jax
import jax.numpy as jnp
from jax.experimental import pallas as pl
from jax.experimental.pallas import tpu as pltpu

_NEG_BIG = -1e30


def _round_up(x, m):
    return (x + m - 1) // m * m


# ----------------------------------------------------------------------------
# Prologue: per-vocab-row logsumexp of the embedding table (run once at prep).
# ----------------------------------------------------------------------------
def _row_lse_kernel(table_ref, lse_ref):
    t = table_ref[...]                                     # (V, Vp) f32
    m = jnp.max(t, axis=-1, keepdims=True)                 # (V, 1)
    s = jnp.sum(jnp.exp(t - m), axis=-1, keepdims=True)    # padded -1e30 lanes -> 0
    lse = m + jnp.log(s)                                   # (V, 1)
    lse_ref[...] = jnp.broadcast_to(lse, lse_ref.shape)    # (V, 128)


def prepare_bigram_params(table):
    """One-time parameter prep: pad the vocab axis (if needed) and precompute the
    per-row logsumexp table.  Hoisted out of the forward so no per-call pad cost."""
    V = table.shape[0]
    Vp = _round_up(V, 128)
    table_f32 = table.astype(jnp.float32)
    if Vp != V:
        # Pad columns with -1e30: exp() underflows to 0 in the lse prologue and the
        # padded lanes are sliced off before logits are returned.
        table_p = jnp.pad(table_f32, ((0, 0), (0, Vp - V)),
                          constant_values=_NEG_BIG)
    else:
        table_p = table_f32

    lse_bcast = pl.pallas_call(
        _row_lse_kernel,
        out_shape=jax.ShapeDtypeStruct((V, 128), jnp.float32),
        grid=(1,),
        in_specs=[pl.BlockSpec((V, Vp), lambda i: (0, 0))],
        out_specs=pl.BlockSpec((V, 128), lambda i: (0, 0)),
        cost_estimate=pl.CostEstimate(flops=4 * V * Vp, transcendentals=V * Vp,
                                      bytes_accessed=V * Vp * 4 + V * 128 * 4),
    )(table_p)

    lse_rows = lse_bcast[:, 0]                              # (V,)
    if Vp != V:
        lse_rows = jnp.pad(lse_rows, (0, Vp - V))
    lse_vec = lse_rows.reshape(1, Vp)                       # lane-major row vector

    return {"table": table_p, "lse": lse_vec, "vocab_size": V}


# ----------------------------------------------------------------------------
# Kernels
# ----------------------------------------------------------------------------
def _bigram_gather_kernel(idx_sref, *refs, G):
    """Inference path: pure row gather (table rows arrive via Element BlockSpecs)."""
    del idx_sref  # only used by the index_maps
    row_refs = refs[:G]
    logits_ref = refs[G]
    for g in range(G):                                      # static unroll, G rows/step
        logits_ref[pl.ds(g, 1), :] = row_refs[g][...]


def _bigram_train_kernel(idx_sref, tgt_sref, *refs, G, n_valid, with_logits):
    """Training path: row gather + cross-entropy from the precomputed row-lse table.

    loss_i = lse_table[idx_i] - table[idx_i, tgt_i]; no exp/log in the hot loop."""
    row_refs = refs[:G]
    lse_ref = refs[G]
    if with_logits:
        logits_ref = refs[G + 1]
        partial_ref = refs[G + 2]
    else:
        logits_ref = None
        partial_ref = refs[G + 1]

    i = pl.program_id(0)
    vp = row_refs[0].shape[-1]
    lane = jax.lax.broadcasted_iota(jnp.int32, (1, vp), 1)
    lse_row = lse_ref[...]                                  # (1, Vp), resident

    acc = jnp.zeros((1, 1), jnp.float32)
    for g in range(G):                                      # static unroll
        tok = i * G + g
        row = row_refs[g][...]                              # (1, Vp) == table[idx[tok]]
        if with_logits:
            logits_ref[pl.ds(g, 1), :] = row
        tgt_g = tgt_sref[tok]                               # SMEM scalar reads
        idx_g = idx_sref[tok]
        picked = jnp.sum(jnp.where(lane == tgt_g, row, 0.0),
                         axis=-1, keepdims=True)            # table[idx, tgt]
        lse_g = jnp.sum(jnp.where(lane == idx_g, lse_row, 0.0),
                        axis=-1, keepdims=True)             # lse_table[idx]
        contrib = lse_g - picked                            # (1, 1)
        if n_valid is not None:                             # only when N % G != 0
            contrib = jnp.where(tok < n_valid, contrib, 0.0)
        acc = acc + contrib

    partial_ref[...] = jnp.zeros_like(partial_ref) + acc    # (1, 128) per-tile partial


# ----------------------------------------------------------------------------
# Forward wrapper
# ----------------------------------------------------------------------------
def _make_row_map_infer(G, g):
    def index_map(i, idx_ref):
        return (idx_ref[i * G + g], 0)                      # element offset, block 0
    return index_map


def _make_row_map_train(G, g):
    def index_map(i, idx_ref, tgt_ref):
        return (idx_ref[i * G + g], 0)
    return index_map


def bigram_forward(params, idx, targets=None, return_logits=True, tokens_per_step=16):
    """Pallas equivalent of BigramLanguageModel.forward.

    params:  output of prepare_bigram_params(table)
    idx:     (B, T) int token ids
    targets: optional (B, T) int

    Returns (logits, loss):
      - targets is None:  logits (B, T, V), loss None
      - else:             logits (B*T, V) (or None if return_logits=False),
                          loss scalar float32 (mean cross-entropy)
    """
    table_p = params["table"]
    lse_vec = params["lse"]
    V = params["vocab_size"]
    Vp = table_p.shape[1]

    B, T = idx.shape
    N = B * T
    G = tokens_per_step
    Np = _round_up(N, G)
    num_tiles = Np // G
    n_valid = None if Np == N else N

    idx_flat = idx.reshape(N).astype(jnp.int32)
    if Np != N:
        idx_flat = jnp.pad(idx_flat, (0, Np - N))           # padded tokens gather row 0

    cparams = pltpu.CompilerParams(dimension_semantics=("parallel",))
    gather_bytes = 2 * Np * Vp * 4 + Np * 4

    # ------------------------------------------------------------------ inference
    if targets is None:
        row_specs = [pl.BlockSpec((pl.Element(1), Vp), _make_row_map_infer(G, g))
                     for g in range(G)]
        logits_p = pl.pallas_call(
            functools.partial(_bigram_gather_kernel, G=G),
            out_shape=jax.ShapeDtypeStruct((Np, Vp), jnp.float32),
            grid_spec=pltpu.PrefetchScalarGridSpec(
                num_scalar_prefetch=1,
                grid=(num_tiles,),
                in_specs=row_specs,
                out_specs=pl.BlockSpec((G, Vp), lambda i, idx_ref: (i, 0)),
            ),
            compiler_params=cparams,
            cost_estimate=pl.CostEstimate(flops=Np * Vp, transcendentals=0,
                                          bytes_accessed=gather_bytes),
        )(idx_flat, *([table_p] * G))
        logits = logits_p
        if Np != N or Vp != V:
            logits = logits[:N, :V]
        return logits.reshape(B, T, V), None

    # ------------------------------------------------------------------ training
    tgt_flat = targets.reshape(N).astype(jnp.int32)
    if Np != N:
        tgt_flat = jnp.pad(tgt_flat, (0, Np - N))

    row_specs = [pl.BlockSpec((pl.Element(1), Vp), _make_row_map_train(G, g))
                 for g in range(G)]
    lse_spec = pl.BlockSpec((1, Vp), lambda i, idx_ref, tgt_ref: (0, 0))
    partial_spec = pl.BlockSpec((1, 128), lambda i, idx_ref, tgt_ref: (i, 0))
    partial_shape = jax.ShapeDtypeStruct((num_tiles, 128), jnp.float32)

    kernel = functools.partial(_bigram_train_kernel, G=G, n_valid=n_valid,
                               with_logits=return_logits)
    cost = pl.CostEstimate(flops=8 * Np * Vp, transcendentals=0,
                           bytes_accessed=gather_bytes + Np * Vp * 4)

    if return_logits:
        logits_p, partials = pl.pallas_call(
            kernel,
            out_shape=(jax.ShapeDtypeStruct((Np, Vp), jnp.float32), partial_shape),
            grid_spec=pltpu.PrefetchScalarGridSpec(
                num_scalar_prefetch=2,
                grid=(num_tiles,),
                in_specs=row_specs + [lse_spec],
                out_specs=(pl.BlockSpec((G, Vp), lambda i, idx_ref, tgt_ref: (i, 0)),
                           partial_spec),
            ),
            compiler_params=cparams,
            cost_estimate=cost,
        )(idx_flat, tgt_flat, *([table_p] * G), lse_vec)
        logits = logits_p
        if Np != N or Vp != V:
            logits = logits[:N, :V]
    else:
        partials = pl.pallas_call(
            kernel,
            out_shape=partial_shape,
            grid_spec=pltpu.PrefetchScalarGridSpec(
                num_scalar_prefetch=2,
                grid=(num_tiles,),
                in_specs=row_specs + [lse_spec],
                out_specs=partial_spec,
            ),
            compiler_params=cparams,
            cost_estimate=cost,
        )(idx_flat, tgt_flat, *([table_p] * G), lse_vec)
        logits = None

    loss = jnp.sum(partials[:, 0]) / jnp.float32(N)
    return logits, loss


# ----------------------------------------------------------------------------
# Reference + self-test
# ----------------------------------------------------------------------------
def _reference(idx, table, targets):
    ref_logits = table[idx.reshape(-1)]
    ref_lse = jax.scipy.special.logsumexp(ref_logits, axis=-1)
    ref_picked = jnp.take_along_axis(ref_logits, targets.reshape(-1, 1), axis=-1)[:, 0]
    return ref_logits, jnp.mean(ref_lse - ref_picked)


if __name__ == "__main__":
    vocab_size = 32
    B, T = 2, 8

    key = jax.random.PRNGKey(0)
    keys = jax.random.split(key, 7)
    table = jax.random.normal(keys[0], (vocab_size, vocab_size), jnp.float32)
    idx = jax.random.randint(keys[1], (B, T), 0, vocab_size, jnp.int32)
    targets = jax.random.randint(keys[2], (B, T), 0, vocab_size, jnp.int32)

    params = prepare_bigram_params(table)                 # pad + row-lse, done once

    # Training path: (B*T, V) logits + scalar mean cross-entropy loss.
    logits, loss = bigram_forward(params, idx, targets)
    logits = jax.block_until_ready(logits)
    loss = jax.block_until_ready(loss)

    # Inference path: (B, T, V) logits, loss is None.
    logits_nt, loss_nt = bigram_forward(params, idx, None)
    logits_nt = jax.block_until_ready(logits_nt)

    ref_logits, ref_loss = _reference(idx, table, targets)
    assert logits.shape == (B * T, vocab_size)
    assert logits_nt.shape == (B, T, vocab_size)
    assert loss_nt is None
    assert jnp.allclose(logits, ref_logits, atol=1e-5)
    assert jnp.allclose(logits_nt.reshape(B * T, vocab_size), ref_logits, atol=1e-5)
    assert jnp.allclose(loss, ref_loss, atol=1e-4)

    # Multi-tile grid (num_tiles > 1), N a multiple of the per-step token count.
    B2, T2 = 8, 100                                       # N = 800 -> 50 grid steps
    idx2 = jax.random.randint(keys[3], (B2, T2), 0, vocab_size, jnp.int32)
    targets2 = jax.random.randint(keys[4], (B2, T2), 0, vocab_size, jnp.int32)
    logits2, loss2 = bigram_forward(params, idx2, targets2)
    logits2 = jax.block_until_ready(logits2)
    loss2 = jax.block_until_ready(loss2)
    ref_logits2, ref_loss2 = _reference(idx2, table, targets2)
    assert logits2.shape == (B2 * T2, vocab_size)
    assert jnp.allclose(logits2, ref_logits2, atol=1e-5)
    assert jnp.allclose(loss2, ref_loss2, atol=1e-4)

    # Loss-only training path (no logits writeback).
    logits_none, loss_only = bigram_forward(params, idx2, targets2, return_logits=False)
    loss_only = jax.block_until_ready(loss_only)
    assert logits_none is None
    assert jnp.allclose(loss_only, ref_loss2, atol=1e-4)

    # Row padding path: N not a multiple of tokens_per_step (exercises valid-token mask).
    B3, T3 = 3, 7                                         # N = 21 -> padded to 32, 2 tiles
    idx3 = jax.random.randint(keys[5], (B3, T3), 0, vocab_size, jnp.int32)
    targets3 = jax.random.randint(keys[6], (B3, T3), 0, vocab_size, jnp.int32)
    logits3, loss3 = bigram_forward(params, idx3, targets3)
    logits3 = jax.block_until_ready(logits3)
    loss3 = jax.block_until_ready(loss3)
    ref_logits3, ref_loss3 = _reference(idx3, table, targets3)
    assert logits3.shape == (B3 * T3, vocab_size)
    assert jnp.allclose(logits3, ref_logits3, atol=1e-5)
    assert jnp.allclose(loss3, ref_loss3, atol=1e-4)

    print("KERNEL_OK")
</pallas_src>

<mosaic_0001>
module attributes {stable_mosaic.version = 11 : i64} {
  func.func @_row_lse_kernel(%arg0: i32, %arg1: memref<32x128xf32, #tpu.memory_space<vmem>>, %arg2: memref<32x128xf32, #tpu.memory_space<vmem>>) attributes {dimension_semantics = [#tpu.dimension_semantics<arbitrary>], iteration_bounds = array<i64: 1>, scalar_prefetch = 0 : i64, scratch_operands = 0 : i64, tpu.core_type = #tpu.core_type<tc>, window_params = [{pipeline_mode = #tpu.pipeline_mode<synchronous>, transform_indices = @transform_0, window_bounds = array<i64: 32, 128>}, {pipeline_mode = #tpu.pipeline_mode<synchronous>, transform_indices = @transform_1, window_bounds = array<i64: 32, 128>}]} {
    %c0 = arith.constant 0 : index
    %c0_0 = arith.constant 0 : index
    %0 = vector.load %arg1[%c0, %c0_0] : memref<32x128xf32, #tpu.memory_space<vmem>>, vector<32x128xf32>
    %cst = arith.constant dense<0xFF800000> : vector<32xf32>
    %1 = vector.multi_reduction <maximumf>, %0, %cst [1] : vector<32x128xf32> to vector<32xf32>
    %2 = vector.shape_cast %1 : vector<32xf32> to vector<32x1xf32>
    %3 = vector.broadcast %2 : vector<32x1xf32> to vector<32x128xf32>
    %4 = arith.subf %0, %3 : vector<32x128xf32>
    %5 = math.exp %4 : vector<32x128xf32>
    %cst_1 = arith.constant dense<0.000000e+00> : vector<32xf32>
    %6 = vector.multi_reduction <add>, %5, %cst_1 [1] : vector<32x128xf32> to vector<32xf32>
    %7 = vector.shape_cast %6 : vector<32xf32> to vector<32x1xf32>
    %8 = math.log %7 : vector<32x1xf32>
    %9 = arith.addf %2, %8 : vector<32x1xf32>
    %10 = vector.shape_cast %9 : vector<32x1xf32> to vector<32x1xf32>
    %11 = vector.broadcast %10 : vector<32x1xf32> to vector<32x128xf32>
    %c0_2 = arith.constant 0 : index
    %c0_3 = arith.constant 0 : index
    %12 = vector.load %arg2[%c0_2, %c0_3] : memref<32x128xf32, #tpu.memory_space<vmem>>, vector<32x128xf32>
    tpu.vector_store %arg2[%c0_2, %c0_3], %11 {strides = array<i32>} : memref<32x128xf32, #tpu.memory_space<vmem>>, vector<32x128xf32>,
    return
  }
  func.func @transform_0(%arg0: i32) -> (i32, i32) {
    %c0_i32 = arith.constant 0 : i32
    %c0_i32_0 = arith.constant 0 : i32
    %c0_i32_1 = arith.constant 0 : i32
    return %c0_i32, %c0_i32_0 : i32, i32
  }
  func.func @transform_1(%arg0: i32) -> (i32, i32) {
    %c0_i32 = arith.constant 0 : i32
    %c0_i32_0 = arith.constant 0 : i32
    %c0_i32_1 = arith.constant 0 : i32
    return %c0_i32, %c0_i32_0 : i32, i32
  }
}

</mosaic_0001>

<bundles_post_ra>
// kernel: tpu_custom_call.1
= control target key start
LH: loop header
LB: loop body
LE: loop exit
PB: predicated region body
PF: predicated region fallthrough
CT: control target
= control target key end

     0   :  { %6 = vsyncpa [#allocation3], 0  ;;  %s200_s0 = inlined_call_operand.hbm [shape: f32[32,128], index: 0, kind: input, shape index: {}]   ;;  %s201_s1 = inlined_call_operand.hbm [shape: f32[32,128], index: 1, kind: output, shape index: {}]  }
   0x1   :  { %7 = vsyncpa [#allocation4], 0  ;;  %s156_s6 = smov [#allocation2]   ;;  %s108_s10 = scalar_lea.hbm %s200_s0, 512 }
   0x2   :  { %s13_s7 = sshll.u32 %s156_s6, 4  ;;  %p109_p0 = scmp.ne.s32.totalorder %s200_s0, %s108_s10  ;;  %s14_s7 = int_to_ptr.vmem [resolvable:$true] %s13_s7 }
   0x3   :  { %p112_p1 = scmp.lt.u32.totalorder %s108_s10, %s200_s0 }
   0x5   :  { %p114_p2 = pnand %p112_p1, %p109_p0 }
   0x7   :  { %117 = shalt.err (!%p114_p2)
}
   0x8   :  { %s118_s15 = scalar_lea.vmem %s14_s7, 512  ;;  %p123_p4 = scmp.lt.s32.totalorder %s14_s7, %s14_s7 }
   0x9   :  { %p119_p3 = scmp.ne.s32.totalorder %s14_s7, %s118_s15  ;;  %p124_p5 = scmp.lt.s32.totalorder %s118_s15, %s118_s15 }
   0xb   :  { %p125_p6 = por %p124_p5, %p123_p4 }
   0xd   :  { %p126_p7 = pnand %p125_p6, %p119_p3 }
   0xf   :  { %129 = shalt.err (!%p126_p7)
}
  0x10   :  { %s157_s16 = smov 128   ;;  %s158_s17 = smov 8  }
  0x11   :  { %19 = dma.hbm_to_vmem [thread:$0]  %s200_s0, 512, %s14_s7, [#allocation3], %s157_s16, %s157_s16, %s158_s17  }
  0x12   :  { %152 = dma.done.wait [#allocation3], 512  }
  0x13   :  { %153 = vsyncadd [#allocation3], 4294966784  ;;  %v23_v0 = vld [vmem:[#allocation2] sm:$0xff]  ;;  %v25_v1 = vld [vmem:[#allocation2 + $0x10] sm:$0xff]  ;;  %s159_s0 = smov [#allocation5]  }
  0x14   :  { %27 = vmax.xlane.f32.xlu0 %v23_v0  ;;  %31 = vmax.xlane.f32.xlu1 %v25_v1  ;;  %v24_v2 = vld [vmem:[#allocation2 + $0x8] sm:$0xff]  ;;  %v26_v3 = vld [vmem:[#allocation2 + $0x18] sm:$0xff]  ;;  %s76_s20 = sshll.u32 %s159_s0, 4  ;;  %s77_s20 = int_to_ptr.vmem [resolvable:$true] %s76_s20 }
  0x15   :  { %s130_s21 = scalar_lea.vmem %s77_s20, 512  ;;  %p135_p9 = scmp.lt.s32.totalorder %s77_s20, %s77_s20 }
  0x16   :  { %p131_p8 = scmp.ne.s32.totalorder %s77_s20, %s130_s21  ;;  %p136_p10 = scmp.lt.s32.totalorder %s130_s21, %s130_s21 }
  0x18   :  { %29 = vmax.xlane.f32.xlu0 %v24_v2  ;;  %33 = vmax.xlane.f32.xlu1 %v26_v3  ;;  %p137_p11 = por %p136_p10, %p135_p9 }
  0x1a   :  { %p138_p12 = pnand %p137_p11, %p131_p8 }
  0xa1   :  { %v28_v4 = vpop.xlane.xlu0 %27  ;;  %v32_v5 = vpop.xlane.xlu1 %31 }
  0xa2   :  { %v35_v6 = vsub.f32 %v23_v0, %v28_v4  ;;  %v37_v7 = vsub.f32 %v25_v1, %v32_v5 }
  0xa4   :  { %v39_v8 = vmul.f32 1.442695, %v35_v6  ;;  %v43_v9 = vmul.f32 1.442695, %v37_v7 }
  0xa5   :  { %v30_v10 = vpop.xlane.xlu0 %29  ;;  %v34_v11 = vpop.xlane.xlu1 %33 }
  0xa6   :  { %92 = vpow2.f32 %v39_v8  ;;  %v36_v12 = vsub.f32 %v24_v2, %v30_v10  ;;  %v38_v13 = vsub.f32 %v26_v3, %v34_v11 }
  0xa7   :  { %94 = vpow2.f32 %v43_v9 }
  0xa8   :  { %v41_v14 = vmul.f32 1.442695, %v36_v12  ;;  %v45_v15 = vmul.f32 1.442695, %v38_v13 }
  0xaa   :  { %96 = vpow2.f32 %v41_v14 }
  0xab   :  { %98 = vpow2.f32 %v45_v15 }
  0xb0   :  { %v93_v16 = vpop.eup %92 }
  0xb1   :  { %47 = vadd.xlane.f32.xlu0 %v93_v16  ;;  %v95_v17 = vpop.eup %94 }
  0xb4   :  { %v97_v18 = vpop.eup %96 }
  0xb5   :  { %51 = vadd.xlane.f32.xlu0 %v95_v17  ;;  %49 = vadd.xlane.f32.xlu1 %v97_v18  ;;  %v99_v19 = vpop.eup %98 }
  0xb9   :  { %53 = vadd.xlane.f32.xlu1 %v99_v19 }
 0x13e   :  { %v48_v20 = vpop.xlane.xlu0 %47 }
 0x13f   :  { %100 = vlog2.f32 %v48_v20 }
 0x142   :  { %v50_v21 = vpop.xlane.xlu1 %49  ;;  %v52_v22 = vpop.xlane.xlu0 %51 }
 0x143   :  { %102 = vlog2.f32 %v50_v21 }
 0x144   :  { %104 = vlog2.f32 %v52_v22 }
 0x146   :  { %v54_v23 = vpop.xlane.xlu1 %53 }
 0x147   :  { %106 = vlog2.f32 %v54_v23 }
 0x149   :  { %v101_v24 = vpop.eup %100 }
 0x14a   :  { %v56_v25 = vmul.f32 0.6931472, %v101_v24 }
 0x14c   :  { %v63_v26 = vadd.f32 %v56_v25, %v28_v4 }
 0x14d   :  { %v103_v27 = vpop.eup %102 }
 0x14e   :  { %v105_v28 = vpop.eup %104  ;;  %67 = vst [vmem:[#allocation5] sm:$0xff] %v63_v26  ;;  %v58_v29 = vmul.f32 0.6931472, %v103_v27 }
 0x14f   :  { %v60_v30 = vmul.f32 0.6931472, %v105_v28 }
 0x150   :  { %v64_v31 = vadd.f32 %v58_v29, %v30_v10 }
 0x151   :  { %v107_v32 = vpop.eup %106  ;;  %v65_v33 = vadd.f32 %v60_v30, %v32_v5 }
 0x152   :  { %68 = vst [vmem:[#allocation5 + $0x8] sm:$0xff] %v64_v31  ;;  %v62_v34 = vmul.f32 0.6931472, %v107_v32 }
 0x153   :  { %69 = vst [vmem:[#allocation5 + $0x10] sm:$0xff] %v65_v33 }
 0x154   :  { %v66_v35 = vadd.f32 %v62_v34, %v34_v11 }
 0x156   :  { %70 = vst [vmem:[#allocation5 + $0x18] sm:$0xff] %v66_v35 }
 0x157   :  { %141 = shalt.err (!%p138_p12)
}
 0x158   :  { %s142_s24 = scalar_lea.hbm %s201_s1, 512 }
 0x159   :  { %p143_p13 = scmp.ne.s32.totalorder %s201_s1, %s142_s24  ;;  %p146_p0 = scmp.lt.u32.totalorder %s142_s24, %s201_s1 }
 0x15b   :  { %p148_p1 = pnand %p146_p0, %p143_p13 }
 0x15d   :  { %151 = shalt.err (!%p148_p1)
}
 0x15e   :  { %82 = dma.vmem_to_hbm [thread:$0]  %s77_s20, 512, %s201_s1, [#allocation4], %s157_s16, %s157_s16, %s158_s17  }
 0x15f   :  { %154 = dma.done.wait [#allocation4], 512  }
 0x160   :  { %155 = vsyncadd [#allocation4], 4294966784 }
 0x161   :  { %86 = vsyncpa [#allocation3], 1 }
 0x162   :  { %87 = vsyncpa [#allocation4], 1 }

</bundles_post_ra>
